<compile_context>
chip_gen: v6e
topology: v6e:2x2x1
jax: 0.10.0
libtpu: 0.0.40
codegen_flags: <defaults>
</compile_context>

<pallas_src>
import jax
import jax.numpy as jnp
from jax.experimental import pallas as pl
from jax.experimental.pallas import tpu as pltpu


def _round_up(x, m):
    return ((x + m - 1) // m) * m


def _mean_agg_kernel(mask_ref, embed_ref, out_ref, acc_ref, rowsum_ref):
    # mask_ref : [tn, tk]  raw (un-normalized) neighbor weights tile
    # embed_ref: [tk, td]  embedding tile of the unique neighbor nodes
    # out_ref  : [tn, td]  weighted-mean aggregated features tile
    # acc_ref  : [tn, td]  f32 matmul accumulator (resident across k)
    # rowsum_ref:[tn, 1]   f32 row-sum accumulator (resident across k)
    k = pl.program_id(2)

    @pl.when(k == 0)
    def _init():
        acc_ref[...] = jnp.zeros_like(acc_ref)
        rowsum_ref[...] = jnp.zeros_like(rowsum_ref)

    mask = mask_ref[...]
    acc_ref[...] += jnp.dot(mask, embed_ref[...],
                            preferred_element_type=jnp.float32)
    rowsum_ref[...] += jnp.sum(mask.astype(jnp.float32), axis=-1,
                               keepdims=True)

    @pl.when(k == pl.num_programs(2) - 1)
    def _finalize():
        rowsum = rowsum_ref[...]
        has_neigh = rowsum > 0.0
        # Rows with no neighbors stay exactly zero (PyTorch skips empty
        # neighbor sets -> empty sparse rows -> zero output rows).
        inv = jnp.where(
            has_neigh,
            pl.reciprocal(jnp.where(has_neigh, rowsum, 1.0), approx=True),
            0.0)
        out_ref[...] = (acc_ref[...] * inv).astype(out_ref.dtype)


def mean_aggregate(mask_raw, embed, *, compute_dtype=jnp.bfloat16,
                   tn_max=256, td_max=512, tk_max=1024):
    """mask_raw: [N, U] raw neighbor weights (row i = batch node i).
       embed   : [U, D] features of the unique neighbor nodes.
       returns : [N, D] float32 aggregated features (== to_feats)."""
    N, U = mask_raw.shape
    U2, D = embed.shape
    assert U == U2
    if N == 0 or U == 0:
        # "if len(v) == 0: return zeros" branch of the PyTorch module.
        return jnp.zeros((N, D), jnp.float32)

    # MXU / (8,128)-aligned tile sizes, clamped to the padded problem. Sized so
    # that double-buffered tiles + scratch stay well under v7x's 64 MiB VMEM.
    tn = min(_round_up(N, 8), tn_max)       # output rows (sublane aligned)
    td = min(_round_up(D, 128), td_max)     # output lanes (lane-dense stores)
    tk = min(_round_up(U, 128), tk_max)     # reduction-axis tile
    Np, Dp, Up = _round_up(N, tn), _round_up(D, td), _round_up(U, tk)

    # Zero padding is numerically inert: padded mask columns / embed rows add
    # nothing to the matmul or the row sums; padded rows give zero outputs that
    # are sliced off below.
    mask_p = jnp.pad(mask_raw.astype(compute_dtype),
                     ((0, Np - N), (0, Up - U)))
    embed_p = jnp.pad(embed.astype(compute_dtype),
                      ((0, Up - U), (0, Dp - D)))

    in_itemsize = jnp.dtype(compute_dtype).itemsize
    # 2x double-buffered input tiles + 2x f32 output tile + f32 scratch.
    tile_bytes = (2 * (tn * tk + tk * td) * in_itemsize
                  + 2 * tn * td * 4
                  + (tn * td + tn) * 4)
    vmem_limit = int(min(max(4 * tile_bytes, 16 << 20), 48 << 20))

    cost = pl.CostEstimate(
        flops=2 * Np * Up * Dp,
        transcendentals=Np,
        bytes_accessed=in_itemsize * (Np * Up + Up * Dp) + 4 * Np * Dp)

    grid = (Np // tn, Dp // td, Up // tk)
    out_p = pl.pallas_call(
        _mean_agg_kernel,
        out_shape=jax.ShapeDtypeStruct((Np, Dp), jnp.float32),
        grid_spec=pltpu.PrefetchScalarGridSpec(
            num_scalar_prefetch=0,
            grid=grid,
            in_specs=[
                pl.BlockSpec((tn, tk), lambda i, j, k: (i, k)),
                pl.BlockSpec((tk, td), lambda i, j, k: (k, j)),
            ],
            out_specs=pl.BlockSpec((tn, td), lambda i, j, k: (i, j)),
            scratch_shapes=[pltpu.VMEM((tn, td), jnp.float32),
                            pltpu.VMEM((tn, 1), jnp.float32)]),
        compiler_params=pltpu.CompilerParams(
            dimension_semantics=("parallel", "parallel", "arbitrary"),
            vmem_limit_bytes=vmem_limit),
        cost_estimate=cost,
    )(mask_p, embed_p)

    return out_p[:N, :D]


def build_graph_inputs(key, num_total_nodes, num_batch_nodes, num_sample, dim):
    """Glue mirroring the Python preprocessing of MeanAggregator_with_weights:
    unique-node dedup, (row, col, weight) scatter, and the feature lookup for
    the unique nodes."""
    k1, k2, k3 = jax.random.split(key, 3)
    # self.features : node id -> feature row (synthetic embedding table)
    feature_table = jax.random.normal(k1, (num_total_nodes, dim),
                                      dtype=jnp.float32)
    # to_neighs: for each batch node, `num_sample` (neighbor_id, weight) pairs
    neigh_ids = jax.random.randint(k2, (num_batch_nodes, num_sample),
                                   0, num_total_nodes)
    neigh_w = jax.random.uniform(k3, (num_batch_nodes, num_sample),
                                 minval=0.1, maxval=1.0, dtype=jnp.float32)

    neigh_ids_h = neigh_ids.tolist()
    neigh_w_h = neigh_w.tolist()

    # TODO(synk): the ragged / data-dependent dedup below has no clean Pallas
    # equivalent; it stays host-side (as it is host-side in PyTorch).
    unique_nodes = {}
    unique_nodes_list = []
    rows, cols, vals = [], [], []
    for i, (ids, ws) in enumerate(zip(neigh_ids_h, neigh_w_h)):
        for n, w in zip(ids, ws):
            n = int(n)
            if n not in unique_nodes:
                unique_nodes[n] = len(unique_nodes_list)
                unique_nodes_list.append(n)
            rows.append(i)
            cols.append(unique_nodes[n])
            vals.append(float(w))

    num_unique = len(unique_nodes_list)
    # Duplicate (row, col) entries accumulate — matches torch.sparse mm on an
    # uncoalesced sparse tensor.
    mask_raw = jnp.zeros((num_batch_nodes, num_unique), jnp.float32)
    mask_raw = mask_raw.at[jnp.asarray(rows, jnp.int32),
                           jnp.asarray(cols, jnp.int32)].add(
        jnp.asarray(vals, jnp.float32))

    # embed_matrix = self.features(unique_nodes_list)
    embed = feature_table[jnp.asarray(unique_nodes_list, jnp.int32)]
    return mask_raw, embed


if __name__ == "__main__":
    key = jax.random.PRNGKey(0)
    NUM_TOTAL_NODES = 64   # size of the feature table (graph nodes)
    NUM_BATCH_NODES = 8    # len(nodes)
    NUM_SAMPLE = 10        # num_sample
    DIM = 32               # self.dim / feature dimension

    mask_raw, embed = build_graph_inputs(
        key, NUM_TOTAL_NODES, NUM_BATCH_NODES, NUM_SAMPLE, DIM)

    # f32 path (tight check of kernel structure) and bf16 path (production
    # config from the perf review: half HBM traffic, f32 MXU accumulation).
    out_f32 = mean_aggregate(mask_raw, embed, compute_dtype=jnp.float32)
    out_bf16 = mean_aggregate(mask_raw, embed, compute_dtype=jnp.bfloat16)
    out_f32, out_bf16 = jax.block_until_ready((out_f32, out_bf16))

    # pure-JAX reference (row-normalized mask, then mask @ embed)
    rowsum = jnp.sum(mask_raw, axis=-1, keepdims=True)
    inv = jnp.where(rowsum > 0.0,
                    1.0 / jnp.where(rowsum > 0.0, rowsum, 1.0), 0.0)
    ref = (mask_raw * inv) @ embed

    assert out_f32.shape == (NUM_BATCH_NODES, DIM)
    assert out_bf16.shape == (NUM_BATCH_NODES, DIM)
    assert out_f32.dtype == jnp.float32
    assert out_bf16.dtype == jnp.float32
    # f32 path: only the approx EUP reciprocal differs from the reference.
    assert jnp.allclose(out_f32, ref, atol=1e-2, rtol=1e-2)
    # bf16 path: bf16 input rounding -> looser tolerance.
    assert jnp.allclose(out_bf16, ref, atol=5e-2, rtol=5e-2)
    print("KERNEL_OK")
</pallas_src>

<mosaic_0001>
module attributes {stable_mosaic.version = 11 : i64} {
  func.func @_mean_agg_kernel(%arg0: i32, %arg1: i32, %arg2: i32, %arg3: memref<8x128xf32, #tpu.memory_space<vmem>>, %arg4: memref<128x128xf32, #tpu.memory_space<vmem>>, %arg5: memref<8x128xf32, #tpu.memory_space<vmem>>, %arg6: memref<8x128xf32, #tpu.memory_space<vmem>>, %arg7: memref<8x1xf32, #tpu.memory_space<vmem>>) attributes {dimension_semantics = [#tpu.dimension_semantics<parallel>, #tpu.dimension_semantics<parallel>, #tpu.dimension_semantics<arbitrary>], iteration_bounds = array<i64: 1, 1, 1>, scalar_prefetch = 0 : i64, scratch_operands = 2 : i64, tpu.core_type = #tpu.core_type<tc>, window_params = [{transform_indices = @transform_0, window_bounds = array<i64: 8, 128>}, {transform_indices = @transform_1, window_bounds = array<i64: 128, 128>}, {transform_indices = @transform_2, window_bounds = array<i64: 8, 128>}]} {
    %c0_i32 = arith.constant 0 : i32
    %0 = arith.cmpi eq, %arg2, %c0_i32 : i32
    %1 = arith.extui %0 : i1 to i32
    %c0_i32_0 = arith.constant 0 : i32
    %2 = arith.cmpi ne, %1, %c0_i32_0 : i32
    scf.if %2 {
      %cst_15 = arith.constant 0.000000e+00 : f32
      %17 = vector.broadcast %cst_15 : f32 to vector<8x128xf32>
      %c0_16 = arith.constant 0 : index
      %c0_17 = arith.constant 0 : index
      %18 = vector.load %arg6[%c0_16, %c0_17] : memref<8x128xf32, #tpu.memory_space<vmem>>, vector<8x128xf32>
      tpu.vector_store %arg6[%c0_16, %c0_17], %17 {strides = array<i32>} : memref<8x128xf32, #tpu.memory_space<vmem>>, vector<8x128xf32>,
      %cst_18 = arith.constant 0.000000e+00 : f32
      %19 = vector.broadcast %cst_18 : f32 to vector<8x1xf32>
      %c0_19 = arith.constant 0 : index
      %c0_20 = arith.constant 0 : index
      %20 = vector.load %arg7[%c0_19, %c0_20] : memref<8x1xf32, #tpu.memory_space<vmem>>, vector<8x1xf32>
      tpu.vector_store %arg7[%c0_19, %c0_20], %19 {strides = array<i32>} : memref<8x1xf32, #tpu.memory_space<vmem>>, vector<8x1xf32>,
    } else {
    }
    %c0 = arith.constant 0 : index
    %c0_1 = arith.constant 0 : index
    %3 = vector.load %arg3[%c0, %c0_1] : memref<8x128xf32, #tpu.memory_space<vmem>>, vector<8x128xf32>
    %c0_2 = arith.constant 0 : index
    %c0_3 = arith.constant 0 : index
    %4 = vector.load %arg6[%c0_2, %c0_3] : memref<8x128xf32, #tpu.memory_space<vmem>>, vector<8x128xf32>
    %c0_4 = arith.constant 0 : index
    %c0_5 = arith.constant 0 : index
    %5 = vector.load %arg4[%c0_4, %c0_5] : memref<128x128xf32, #tpu.memory_space<vmem>>, vector<128x128xf32>
    %cst = arith.constant dense<0.000000e+00> : vector<8x128xf32>
    %6 = tpu.matmul %3, %5, %cst {dimension_numbers = #tpu.dot_dimension_numbers<[1], [0], [0], [1], [0, 0, 1, 1], [], []>} : vector<8x128xf32>, vector<128x128xf32>, vector<8x128xf32> -> vector<8x128xf32>
    %7 = arith.addf %4, %6 : vector<8x128xf32>
    %c0_6 = arith.constant 0 : index
    %c0_7 = arith.constant 0 : index
    %8 = vector.load %arg6[%c0_6, %c0_7] : memref<8x128xf32, #tpu.memory_space<vmem>>, vector<8x128xf32>
    tpu.vector_store %arg6[%c0_6, %c0_7], %7 {strides = array<i32>} : memref<8x128xf32, #tpu.memory_space<vmem>>, vector<8x128xf32>,
    %c0_8 = arith.constant 0 : index
    %c0_9 = arith.constant 0 : index
    %9 = vector.load %arg7[%c0_8, %c0_9] : memref<8x1xf32, #tpu.memory_space<vmem>>, vector<8x1xf32>
    %cst_10 = arith.constant dense<0.000000e+00> : vector<8xf32>
    %10 = vector.multi_reduction <add>, %3, %cst_10 [1] : vector<8x128xf32> to vector<8xf32>
    %11 = vector.shape_cast %10 : vector<8xf32> to vector<8x1xf32>
    %12 = arith.addf %9, %11 : vector<8x1xf32>
    %c0_11 = arith.constant 0 : index
    %c0_12 = arith.constant 0 : index
    %13 = vector.load %arg7[%c0_11, %c0_12] : memref<8x1xf32, #tpu.memory_space<vmem>>, vector<8x1xf32>
    tpu.vector_store %arg7[%c0_11, %c0_12], %12 {strides = array<i32>} : memref<8x1xf32, #tpu.memory_space<vmem>>, vector<8x1xf32>,
    %c0_i32_13 = arith.constant 0 : i32
    %14 = arith.cmpi eq, %arg2, %c0_i32_13 : i32
    %15 = arith.extui %14 : i1 to i32
    %c0_i32_14 = arith.constant 0 : i32
    %16 = arith.cmpi ne, %15, %c0_i32_14 : i32
    scf.if %16 {
      %c0_15 = arith.constant 0 : index
      %c0_16 = arith.constant 0 : index
      %17 = vector.load %arg7[%c0_15, %c0_16] : memref<8x1xf32, #tpu.memory_space<vmem>>, vector<8x1xf32>
      %cst_17 = arith.constant 0.000000e+00 : f32
      %18 = vector.broadcast %cst_17 : f32 to vector<8x1xf32>
      %19 = arith.cmpf ogt, %17, %18 : vector<8x1xf32>
      %cst_18 = arith.constant 1.000000e+00 : f32
      %20 = vector.broadcast %cst_18 : f32 to vector<8x1xf32>
      %21 = arith.select %19, %17, %20 : vector<8x1xi1>, vector<8x1xf32>
      %22 = tpu.reciprocal %21 {approx = true} : vector<8x1xf32> -> vector<8x1xf32>
      %cst_19 = arith.constant 0.000000e+00 : f32
      %23 = vector.broadcast %cst_19 : f32 to vector<8x1xf32>
      %24 = arith.select %19, %22, %23 : vector<8x1xi1>, vector<8x1xf32>
      %c0_20 = arith.constant 0 : index
      %c0_21 = arith.constant 0 : index
      %25 = vector.load %arg6[%c0_20, %c0_21] : memref<8x128xf32, #tpu.memory_space<vmem>>, vector<8x128xf32>
      %26 = vector.broadcast %24 : vector<8x1xf32> to vector<8x128xf32>
      %27 = arith.mulf %25, %26 : vector<8x128xf32>
      %c0_22 = arith.constant 0 : index
      %c0_23 = arith.constant 0 : index
      %28 = vector.load %arg5[%c0_22, %c0_23] : memref<8x128xf32, #tpu.memory_space<vmem>>, vector<8x128xf32>
      tpu.vector_store %arg5[%c0_22, %c0_23], %27 {strides = array<i32>} : memref<8x128xf32, #tpu.memory_space<vmem>>, vector<8x128xf32>,
    } else {
    }
    return
  }
  func.func @transform_0(%arg0: i32, %arg1: i32, %arg2: i32) -> (i32, i32) {
    %c0_i32 = arith.constant 0 : i32
    return %arg0, %arg2 : i32, i32
  }
  func.func @transform_1(%arg0: i32, %arg1: i32, %arg2: i32) -> (i32, i32) {
    %c0_i32 = arith.constant 0 : i32
    return %arg2, %arg1 : i32, i32
  }
  func.func @transform_2(%arg0: i32, %arg1: i32, %arg2: i32) -> (i32, i32) {
    %c0_i32 = arith.constant 0 : i32
    return %arg0, %arg1 : i32, i32
  }
}

</mosaic_0001>

<bundles_post_ra>
// kernel: tpu_custom_call.1
= control target key start
LH: loop header
LB: loop body
LE: loop exit
PB: predicated region body
PF: predicated region fallthrough
CT: control target
= control target key end

     0   :  { %7 = vsyncpa [#allocation5], 0  ;;  %s336_s0 = inlined_call_operand.hbm [shape: f32[8,128], index: 0, kind: input, shape index: {}]   ;;  %s337_s1 = inlined_call_operand.hbm [shape: f32[128,128], index: 1, kind: input, shape index: {}]   ;;  %s338_s2 = inlined_call_operand.hbm [shape: f32[8,128], index: 2, kind: output, shape index: {}]  }
   0x1   :  { %8 = vsyncpa [#allocation8], 0 }
   0x2   :  { %9 = vsyncpa [#allocation6], 0  ;;  %s302_s9 = smov [#allocation4]   ;;  %s303_s11 = smov [#allocation7]  }
   0x3   :  { %s16_s10 = sshll.u32 %s302_s9, 4  ;;  %s25_s12 = sshll.u32 %s303_s11, 4  ;;  %s17_s10 = int_to_ptr.vmem [resolvable:$true] %s16_s10  ;;  %s26_s12 = int_to_ptr.vmem [resolvable:$true] %s25_s12 }
   0x4   :  { %s244_s13 = scalar_lea.vmem %s17_s10, 128  ;;  %p249_p1 = scmp.lt.s32.totalorder %s17_s10, %s17_s10 }
   0x5   :  { %p245_p0 = scmp.ne.s32.totalorder %s17_s10, %s244_s13  ;;  %p250_p2 = scmp.lt.s32.totalorder %s244_s13, %s244_s13 }
   0x7   :  { %p251_p3 = por %p250_p2, %p249_p1 }
   0x9   :  { %p252_p4 = pnand %p251_p3, %p245_p0 }
   0xb   :  { %255 = shalt.err (!%p252_p4)
}
   0xc   :  { %19 = dma.hbm_to_vmem [thread:$0]  %s336_s0, 128, %s17_s10, [#allocation5]  }
   0xd   :  { %s264_s16 = scalar_lea.vmem %s26_s12, 2048  ;;  %p269_p6 = scmp.lt.s32.totalorder %s26_s12, %s26_s12 }
   0xe   :  { %p265_p5 = scmp.ne.s32.totalorder %s26_s12, %s264_s16  ;;  %p270_p7 = scmp.lt.s32.totalorder %s264_s16, %s264_s16 }
  0x10   :  { %p271_p8 = por %p270_p7, %p269_p6 }
  0x12   :  { %p272_p9 = pnand %p271_p8, %p265_p5 }
  0x14   :  { %275 = shalt.err (!%p272_p9)
}
  0x15   :  { %s304_s17 = smov 128   ;;  %s305_s18 = smov 8  }
  0x16   :  { %31 = dma.hbm_to_vmem [thread:$0]  %s337_s1, 2048, %s26_s12, [#allocation8], %s304_s17, %s304_s17, %s305_s18  }
  0x17   :  { %296 = dma.done.wait [#allocation5], 128  }
  0x18   :  { %297 = vsyncadd [#allocation5], 4294967168 }
  0x19   :  { %298 = dma.done.wait [#allocation8], 2048  }
  0x1a   :  { %299 = vsyncadd [#allocation8], 4294965248  ;;  %vm43_vm0 = vcmask 7168   ;;  %v306_v0 = vmov 0.0   ;;  %vm307_vm1 = vmmov 0   ;;  %v45_v1 = vld [vmem:[#allocation4] sm:$0xff] }
  0x1b   :  { %190 = vmatprep.subr.mxu0 %v306_v0  ;;  %222 = vmatprep.mubr.msk.f32.mxu0 %vm307_vm1, %v306_v0  ;;  %44 = vst.msk [vmem:[#allocation3] sm:$0xff] %vm43_vm0, %v306_v0  ;;  %v62_v2 = vld [vmem:[#allocation7 + $0x78] sm:$0xff]  ;;  %v61_v3 = vld [vmem:[#allocation7 + $0x70] sm:$0xff]  ;;  %v60_v4 = vld [vmem:[#allocation7 + $0x68] sm:$0xff]  ;;  %v308_v11 = vmov 0   ;;  %s309_s0 = smov [#allocation9]  }
  0x1c   :  { %136 = vadd.xlane.f32.xlu0 %v45_v1  ;;  %191 = vmatpush3.msra.mxu0 %v62_v2  ;;  %v59_v5 = vld [vmem:[#allocation7 + $0x60] sm:$0xff]  ;;  %v58_v6 = vld [vmem:[#allocation7 + $0x58] sm:$0xff]  ;;  %v57_v7 = vld [vmem:[#allocation7 + $0x50] sm:$0xff]  ;;  %s163_s1 = sshll.u32 %s309_s0, 4  ;;  %s164_s1 = int_to_ptr.vmem [resolvable:$true] %s163_s1 }
  0x1d   :  { %192 = vmatprep.subr.mxu0 %v306_v0  ;;  %v56_v8 = vld [vmem:[#allocation7 + $0x48] sm:$0xff]  ;;  %v55_v9 = vld [vmem:[#allocation7 + $0x40] sm:$0xff]  ;;  %v54_v10 = vld [vmem:[#allocation7 + $0x38] sm:$0xff]  ;;  %233 = vset.pattern.permute.xlu0 %v308_v11  ;;  %s276_s21 = scalar_lea.vmem %s164_s1, 128  ;;  %p281_p11 = scmp.lt.s32.totalorder %s164_s1, %s164_s1 }
  0x1e   :  { %193 = vmatpush3.msra.mxu0 %v61_v3  ;;  %v53_v12 = vld [vmem:[#allocation7 + $0x30] sm:$0xff]  ;;  %v52_v13 = vld [vmem:[#allocation7 + $0x28] sm:$0xff]  ;;  %v51_v14 = vld [vmem:[#allocation7 + $0x20] sm:$0xff]  ;;  %p277_p10 = scmp.ne.s32.totalorder %s164_s1, %s276_s21  ;;  %p282_p12 = scmp.lt.s32.totalorder %s276_s21, %s276_s21 }
  0x1f   :  { %194 = vmatprep.subr.mxu0 %v306_v0  ;;  %v50_v15 = vld [vmem:[#allocation7 + $0x18] sm:$0xff]  ;;  %v49_v16 = vld [vmem:[#allocation7 + $0x10] sm:$0xff]  ;;  %v48_v17 = vld [vmem:[#allocation7 + $0x8] sm:$0xff] }
  0x20   :  { %195 = vmatpush3.msra.mxu0 %v60_v4  ;;  %v47_v18 = vld [vmem:[#allocation7] sm:$0xff]  ;;  %p283_p13 = por %p282_p12, %p281_p11 }
  0x21   :  { %196 = vmatprep.subr.mxu0 %v306_v0 }
  0x22   :  { %197 = vmatpush3.msra.mxu0 %v59_v5  ;;  %v135_v19 = vld [vmem:[#allocation3] sm:$0xff]  ;;  %p284_p0 = pnand %p283_p13, %p277_p10 }
  0x23   :  { %198 = vmatprep.subr.mxu0 %v306_v0 }
  0x24   :  { %199 = vmatpush3.msra.mxu0 %v58_v6 }
  0x25   :  { %200 = vmatprep.subr.mxu0 %v306_v0 }
  0x26   :  { %201 = vmatpush3.msra.mxu0 %v57_v7 }
  0x27   :  { %202 = vmatprep.subr.mxu0 %v306_v0 }
  0x28   :  { %203 = vmatpush3.msra.mxu0 %v56_v8 }
  0x29   :  { %204 = vmatprep.subr.mxu0 %v306_v0 }
  0x2a   :  { %205 = vmatpush3.msra.mxu0 %v55_v9 }
  0x2b   :  { %206 = vmatprep.subr.mxu0 %v306_v0 }
  0x2c   :  { %207 = vmatpush3.msra.mxu0 %v54_v10 }
  0x2d   :  { %208 = vmatprep.subr.mxu0 %v306_v0 }
  0x2e   :  { %209 = vmatpush3.msra.mxu0 %v53_v12 }
  0x2f   :  { %210 = vmatprep.subr.mxu0 %v306_v0 }
  0x30   :  { %211 = vmatpush3.msra.mxu0 %v52_v13 }
  0x31   :  { %212 = vmatprep.subr.mxu0 %v306_v0 }
  0x32   :  { %213 = vmatpush3.msra.mxu0 %v51_v14 }
  0x33   :  { %214 = vmatprep.subr.mxu0 %v306_v0 }
  0x34   :  { %215 = vmatpush3.msra.mxu0 %v50_v15 }
  0x35   :  { %216 = vmatprep.subr.mxu0 %v306_v0 }
  0x36   :  { %217 = vmatpush3.msra.mxu0 %v49_v16 }
  0x37   :  { %218 = vmatprep.subr.mxu0 %v306_v0 }
  0x38   :  { %219 = vmatpush3.msra.mxu0 %v48_v17 }
  0x39   :  { %220 = vmatprep.subr.mxu0 %v306_v0 }
  0x3a   :  { %221 = vmatpush3.msra.mxu0 %v47_v18 }
  0x3b   :  { %223 = vmatmul.mubr.f32.vlgmr.msra.gmra.mxu0 %v45_v1 }
  0xa5   :  { %v137_v20 = vpop.xlane.xlu0 %136 }
  0xa6   :  { %v138_v21 = vadd.f32 %v137_v20, %v135_v19 }
  0xa8   :  { %140 = vst.msk [vmem:[#allocation3] sm:$0xff] %vm43_vm0, %v138_v21 }
  0xaf   :  { %v144_v22 = vld [vmem:[#allocation3] sm:$0xff] }
  0xb0   :  { %vm145_vm2 = vcmp.gt.f32.partialorder %v144_v22, 0.0 }
  0xb1   :  { %v146_v23 = vsel %vm145_vm2, %v144_v22, 1.0 }
  0xb2   :  { %234 = vrcp.f32 %v146_v23 }
  0xbf   :  { %v235_v24 = vpop.eup %234 }
  0xc0   :  { %v148_v25 = vsel %vm145_vm2, %v235_v24, 0.0 }
  0xc1   :  { %152 = vperm.xlu0 %233, %v148_v25  }
  0xfb   :  { %v129_v26 = vpop.f32.mrf.mxu0 }
  0xfd   :  { %v224_v27 = vpop.f32.mrf.mxu0 }
 0x13c   :  { %v153_v28 = vpop.permute.xlu0 %152 }
 0x13d   :  { %v155_v29 = vmul.f32 %v153_v28, %v129_v26 }
 0x13f   :  { %156 = vst [vmem:[#allocation9] sm:$0xff] %v155_v29 }
 0x140   :  { %287 = shalt.err (!%p284_p0)
}
 0x141   :  { %166 = dma.vmem_to_hbm [thread:$0]  %s164_s1, 128, %s338_s2, [#allocation6]  }
 0x142   :  { %300 = dma.done.wait [#allocation6], 128  }
 0x143   :  { %301 = vsyncadd [#allocation6], 4294967168 }
 0x144   :  { %170 = vsyncpa [#allocation5], 1 }
 0x145   :  { %171 = vsyncpa [#allocation8], 1 }
 0x146   :  { %172 = vsyncpa [#allocation6], 1 }

</bundles_post_ra>
